<compile_context>
chip_gen: v6e
topology: v6e:2x2x1
jax: 0.10.0
libtpu: 0.0.40
codegen_flags: <defaults>
</compile_context>

<pallas_src>
import math

import jax
import jax.numpy as jnp
from jax.experimental import pallas as pl
from jax.experimental.pallas import tpu as pltpu


# ----------------------------------------------------------------------------
# Pallas kernel: out = x + scale * pe   (pe broadcast over batch and space)
# ----------------------------------------------------------------------------
def _pe_add_kernel(scale_ref, x_ref, pe_ref, o_ref):
    # scale_ref: SMEM (1,) scalar parameter
    # x_ref:  VMEM tile (1, TT, S, D)
    # pe_ref: VMEM tile (TT, 1, D)  -> broadcasts over batch (leading 1) and S
    s = scale_ref[0]
    o_ref[...] = (x_ref[...] + s * pe_ref[...]).astype(o_ref.dtype)


def positional_encoding_spatiotemporal_forward(
    x, scale, pe, *, target_block_bytes=6 * 1024 * 1024
):
    """x: (B, T, S, D); scale: (1,); pe: (max_len, 1, D).  Returns (B, T, S, D)."""
    B, T, S, D = x.shape
    pe_slice = pe[:T]  # (T, 1, D) -- static slice, plain JAX glue

    itemsize = x.dtype.itemsize
    bytes_per_t = S * D * itemsize

    # Time-tile size: as many t-rows per grid step as fit the byte target.
    TT = max(1, min(T, target_block_bytes // max(bytes_per_t, 1)))
    # Keep >= 2 grid steps when possible so both v7x TensorCores get work.
    if B == 1 and TT >= T and T > 1:
        TT = pl.cdiv(T, 2)
    num_t_blocks = pl.cdiv(T, TT)
    grid = (B, num_t_blocks)

    # VMEM budget: double-buffered x-in + out blocks, plus the small pe blocks.
    block_bytes = TT * S * D * itemsize
    pe_bytes = TT * D * itemsize
    need = 4 * block_bytes + 2 * pe_bytes + (1 << 20)
    vmem_limit_bytes = int(min(48 * 1024 * 1024, max(32 * 1024 * 1024, need)))

    return pl.pallas_call(
        _pe_add_kernel,
        out_shape=jax.ShapeDtypeStruct((B, T, S, D), x.dtype),
        grid=grid,
        in_specs=[
            pl.BlockSpec(memory_space=pltpu.SMEM),                  # scale scalar
            pl.BlockSpec((1, TT, S, D), lambda b, j: (b, j, 0, 0)),  # x tile
            pl.BlockSpec((TT, 1, D), lambda b, j: (j, 0, 0)),        # pe tile
        ],
        out_specs=pl.BlockSpec((1, TT, S, D), lambda b, j: (b, j, 0, 0)),
        compiler_params=pltpu.CompilerParams(
            dimension_semantics=("parallel", "parallel"),
            vmem_limit_bytes=vmem_limit_bytes,
        ),
    )(scale, x, pe_slice)


# ----------------------------------------------------------------------------
# Parameter / buffer construction (deterministic, mirrors nn.Module.__init__)
# ----------------------------------------------------------------------------
def make_positional_encoding_params(d_model, max_len=5000, dtype=jnp.float32):
    # scale = nn.Parameter(torch.ones(1))
    scale = jnp.ones((1,), dtype=jnp.float32)

    # pe buffer: sin on even features, cos on odd features
    position = jnp.arange(0, max_len, dtype=jnp.float32)[:, None]          # (L, 1)
    div_term = jnp.exp(
        jnp.arange(0, d_model, 2, dtype=jnp.float32)
        * (-math.log(10000.0) / d_model))                                   # (ceil(D/2),)
    angles = position * div_term                                            # (L, ceil(D/2))
    pe = jnp.zeros((max_len, d_model), dtype=jnp.float32)
    pe = pe.at[:, 0::2].set(jnp.sin(angles))
    # slice guards the odd-d_model edge case (PyTorch original errors there)
    pe = pe.at[:, 1::2].set(jnp.cos(angles)[:, : d_model // 2])
    # pe.unsqueeze(0).transpose(0, 1)  ->  (max_len, 1, d_model)
    pe = pe[:, None, :].astype(dtype)
    return scale, pe


if __name__ == "__main__":
    # x: (batch=2, time=8, spatial=16, d_model=32)
    B, T, S, D_MODEL = 2, 8, 16, 32
    MAX_LEN = 64  # small max_len for the example; same construction as 5000

    scale, pe = make_positional_encoding_params(D_MODEL, max_len=MAX_LEN)

    key = jax.random.PRNGKey(0)
    x = jax.random.normal(key, (B, T, S, D_MODEL), dtype=jnp.float32)

    out = positional_encoding_spatiotemporal_forward(x, scale, pe)
    out = jax.block_until_ready(out)

    # pure-JAX reference mirroring the PyTorch forward (permute / add / permute)
    xp = jnp.transpose(x, (1, 0, 2, 3))                  # (T, B, S, D)
    xp = xp + scale[0] * pe[:T][:, None, :, :]           # pe[:T]: (T,1,D) -> (T,1,1,D)
    ref = jnp.transpose(xp, (1, 0, 2, 3))                # (B, T, S, D)

    assert out.shape == x.shape
    assert jnp.allclose(out, ref, atol=1e-6, rtol=1e-6)

    print("KERNEL_OK")
</pallas_src>

<mosaic_0001>
module attributes {stable_mosaic.version = 11 : i64} {
  func.func @_pe_add_kernel(%arg0: i32, %arg1: i32, %arg2: memref<1xf32, #tpu.memory_space<smem>>, %arg3: memref<1x8x16x32xf32, #tpu.memory_space<vmem>>, %arg4: memref<8x1x32xf32, #tpu.memory_space<vmem>>, %arg5: memref<1x8x16x32xf32, #tpu.memory_space<vmem>>) attributes {dimension_semantics = [#tpu.dimension_semantics<parallel>, #tpu.dimension_semantics<parallel>], iteration_bounds = array<i64: 2, 1>, scalar_prefetch = 0 : i64, scratch_operands = 0 : i64, tpu.core_type = #tpu.core_type<tc>, window_params = [{transform_indices = @transform_0, window_bounds = array<i64: 1>}, {transform_indices = @transform_1, window_bounds = array<i64: 1, 8, 16, 32>}, {transform_indices = @transform_2, window_bounds = array<i64: 8, 1, 32>}, {transform_indices = @transform_3, window_bounds = array<i64: 1, 8, 16, 32>}]} {
    %c0 = arith.constant 0 : index
    %0 = memref.load %arg2[%c0] : memref<1xf32, #tpu.memory_space<smem>>
    %c0_0 = arith.constant 0 : index
    %c0_1 = arith.constant 0 : index
    %c0_2 = arith.constant 0 : index
    %c0_3 = arith.constant 0 : index
    %1 = vector.load %arg3[%c0_0, %c0_1, %c0_2, %c0_3] : memref<1x8x16x32xf32, #tpu.memory_space<vmem>>, vector<1x8x16x32xf32>
    %c0_4 = arith.constant 0 : index
    %c0_5 = arith.constant 0 : index
    %c0_6 = arith.constant 0 : index
    %2 = vector.load %arg4[%c0_4, %c0_5, %c0_6] : memref<8x1x32xf32, #tpu.memory_space<vmem>>, vector<8x1x32xf32>
    %3 = vector.broadcast %0 : f32 to vector<8x1x32xf32>
    %4 = arith.mulf %3, %2 : vector<8x1x32xf32>
    %5 = vector.shape_cast %4 : vector<8x1x32xf32> to vector<1x8x1x32xf32>
    %6 = vector.broadcast %5 : vector<1x8x1x32xf32> to vector<1x8x16x32xf32>
    %7 = arith.addf %1, %6 : vector<1x8x16x32xf32>
    %c0_7 = arith.constant 0 : index
    %c0_8 = arith.constant 0 : index
    %c0_9 = arith.constant 0 : index
    %c0_10 = arith.constant 0 : index
    %8 = vector.load %arg5[%c0_7, %c0_8, %c0_9, %c0_10] : memref<1x8x16x32xf32, #tpu.memory_space<vmem>>, vector<1x8x16x32xf32>
    tpu.vector_store %arg5[%c0_7, %c0_8, %c0_9, %c0_10], %7 {strides = array<i32>} : memref<1x8x16x32xf32, #tpu.memory_space<vmem>>, vector<1x8x16x32xf32>,
    return
  }
  func.func @transform_0(%arg0: i32, %arg1: i32) -> i32 {
    %c0_i32 = arith.constant 0 : i32
    %c0_i32_0 = arith.constant 0 : i32
    return %c0_i32 : i32
  }
  func.func @transform_1(%arg0: i32, %arg1: i32) -> (i32, i32, i32, i32) {
    %c0_i32 = arith.constant 0 : i32
    %c0_i32_0 = arith.constant 0 : i32
    %c0_i32_1 = arith.constant 0 : i32
    return %arg0, %arg1, %c0_i32, %c0_i32_0 : i32, i32, i32, i32
  }
  func.func @transform_2(%arg0: i32, %arg1: i32) -> (i32, i32, i32) {
    %c0_i32 = arith.constant 0 : i32
    %c0_i32_0 = arith.constant 0 : i32
    %c0_i32_1 = arith.constant 0 : i32
    return %arg1, %c0_i32, %c0_i32_0 : i32, i32, i32
  }
  func.func @transform_3(%arg0: i32, %arg1: i32) -> (i32, i32, i32, i32) {
    %c0_i32 = arith.constant 0 : i32
    %c0_i32_0 = arith.constant 0 : i32
    %c0_i32_1 = arith.constant 0 : i32
    return %arg0, %arg1, %c0_i32, %c0_i32_0 : i32, i32, i32, i32
  }
}

</mosaic_0001>

<bundles_post_ra>
// kernel: tpu_custom_call.1
= control target key start
LH: loop header
LB: loop body
LE: loop exit
PB: predicated region body
PF: predicated region fallthrough
CT: control target
= control target key end

     0   :  { %s984_s0 = inlined_call_operand.<no memory space> [shape: f32[1], index: 0, kind: input, shape index: {}]   ;;  %s985_s1 = inlined_call_operand.hbm [shape: f32[2,8,16,32], index: 1, kind: input, shape index: {}]   ;;  %s986_s2 = inlined_call_operand.hbm [shape: f32[8,1,32], index: 2, kind: input, shape index: {}]   ;;  %s987_s3 = inlined_call_operand.hbm [shape: f32[2,8,16,32], index: 3, kind: output, shape index: {}]  }
   0x1   :  { %8 = sst [smem:[#allocation2]] %s984_s0 }
   0x2   :  { %9 = vsyncpa [#allocation4], 0 }
   0x3   :  { %11 = vsyncpa [#allocation4 + $0x1], 0 }
   0x4   :  { %12 = vsyncpa [#allocation7], 0 }
   0x5   :  { %13 = vsyncpa [#allocation5], 0 }
   0x6   :  { %15 = vsyncpa [#allocation5 + $0x1], 0  ;;  %s736_s14 = smov 0   ;;  %s738_s15 = smov 0  }
   0x7   :  { %s740_s16 = smov 0   ;;  %s742_s17 = smov 0  }
   0x8   :  { %s744_s18 = smov 0   ;;  %s746_s19 = smov 0  }
   0x9 LB: > { %s466_s0 = sadd.s32 4294967295, %s702_s19   ;;  %s467_s20 = sadd.s32 4294967294, %s702_s19   ;;  %s702_s19 = sphi %s746_s19, %s21_s19   ;;  %s698_s18 = sphi %s744_s18, %s1005_s18   ;;  %s694_s17 = sphi %s742_s17, %s1004_s17   ;;  %s690_s16 = sphi %s740_s16, %s1003_s16   ;;  %s686_s15 = sphi %s738_s15, %s1002_s15   ;;  %s682_s14 = sphi %s736_s14, %s1001_s14  }
   0xa   : > { %p76_p0 = scmp.ne.s32.totalorder %s686_s15, %s682_s14  ;;  %p770_p1 = scmp.eq.s32.totalorder %s466_s0, 0 }
   0xb   : > { %p774_p2 = scmp.eq.s32.totalorder %s466_s0, 1  ;;  %p134_p3 = scmp.eq.s32.totalorder %s467_s20, 1 }
   0xc   : > { %p780_p4 = por %p770_p1, %p76_p0  ;;  %p468_p5 = scmp.ge.s32.totalorder %s702_s19, 1 }
   0xd   : > { %p785_p6 = por %p134_p3, %p76_p0  ;;  %p141_p7 = scmp.lt.s32.totalorder %s702_s19, 3 }
   0xe   : > { %s991_s23 = scalar_select %p780_p4, 1, 0 }
   0xf   : > { %s992_s24 = scalar_select %p785_p6, 1, 0 }
  0x10   : > { %p790_p8 = pnand %p468_p5, %p141_p7  ;;  %s704_s26 = smov [#allocation6]  }
  0x11   : > { %s159_s27 = sshll.u32 %s704_s26, 4  ;;  %s33_s29 = sadd.s32 1, %s698_s18  ;;  %s160_s27 = int_to_ptr.vmem [resolvable:$true] %s159_s27 }
  0x12   : > { %p493_p9 = pneg %p790_p8  ;;  %s575_s30 = scalar_lea.vmem %s160_s27, 128 }
  0x13   : > { %p576_p13 = scmp.ne.s32.totalorder %s160_s27, %s575_s30  ;;  %p583_p5 = scmp.lt.s32.totalorder %s160_s27, %s160_s27 }
  0x14   : > { %p799_p11 = pnand %p493_p9, %p770_p1  ;;  %p584_p7 = scmp.lt.s32.totalorder %s575_s30, %s575_s30 }
  0x16   : > { %p566_p12 = pneg %p799_p11  ;;  %p585_p6 = por %p584_p7, %p583_p5 }
  0x18   : > { %p578_p0 = pnand %p576_p13, %p566_p12 }
  0x1a   : > { %p579_p3 = pneg %p578_p0 }
  0x1c   : > { %p586_p4 = pnand %p585_p6, %p579_p3 }
  0x1e   : > { %589 = shalt.err (!%p586_p4)
}
  0x1f   : > { %s705_s4 = smov 16   ;;  %s706_s5 = smov 1  }
  0x20   : > { %496 = dma.hbm_to_vmem [thread:$0]  (!%p799_p11), %s986_s2, 128, %s160_s27, [#allocation7], %s705_s4, %s705_s4, %s706_s5  }
  0x21   : > { %p35_p6 = scmp.ge.s32.totalorder %s33_s29, 2  ;;  %s63_s8 = sadd.s32 1, %s690_s16 }
  0x22   : > { %p70_p4 = scmp.ne.s32.totalorder %s690_s16, %s686_s15  ;;  %p71_p9 = scmp.eq.s32.totalorder %s702_s19, 0 }
  0x23   : > { %s1007_s29 = smov (%p35_p6, %s33_s29), 0  ;;  %p506_p0 = scmp.lt.s32.totalorder %s702_s19, 2 }
  0x24   : > { %p817_p12 = por %p71_p9, %p70_p4  ;;  %p823_p13 = por %p774_p2, %p70_p4 }
  0x25   : > { %s58_s11 = ssub.s32 %s698_s18, %s1007_s29  ;;  %s173_s12 = sand.u32 1, %s690_s16  }
  0x26   : > { %p61_p11 = scmp.eq.s32.totalorder %s58_s11, 0  ;;  %s471_s13 = sshll.u32 %s173_s12, 7 }
  0x27   : > { %s483_s20 = sshll.u32 %s698_s18, 11  ;;  %s177_s30 = scalar_lea.vmem [#allocation3], %s471_s13 }
  0x28   : > { %s832_s0 = scalar_select %p61_p11, %s690_s16, %s63_s8  }
  0x29   : > { %s186_s28 = scalar_lea.hbm %s985_s1, %s483_s20  ;;  %s187_s4 = sshll.u32 %s177_s30, 4  ;;  %s188_s4 = int_to_ptr.vmem [resolvable:$true] %s187_s4 }
  0x2a   : > { %p840_p2 = pnand %p506_p0, %p817_p12  ;;  %s174_s5 = scalar_lea.sflag [#allocation4], %s173_s12 }
  0x2b   : > { %s603_s6 = scalar_lea.vmem %s188_s4, 2048  ;;  %s707_s7 = smov [#allocation3]  }
  0x2c   : > { %p592_p3 = pneg %p840_p2  ;;  %p604_p5 = scmp.ne.s32.totalorder %s188_s4, %s603_s6 }
  0x2d   : > { %s608_s8 = sshll.u32 %s707_s7, 4  ;;  %s609_s8 = int_to_ptr.vmem [resolvable:$false] %s608_s8 }
  0x2e   : > { %p606_p7 = pnand %p604_p5, %p592_p3  ;;  %s610_s11 = scalar_lea.vmem %s609_s8, 4096 }
  0x2f   : > { %p611_p4 = scmp.lt.s32.totalorder %s188_s4, %s609_s8  ;;  %p612_p9 = scmp.lt.s32.totalorder %s610_s11, %s603_s6 }
  0x30   : > { %p607_p6 = pneg %p606_p7 }
  0x31   : > { %p613_p11 = por %p612_p9, %p611_p4 }
  0x33   : > { %p614_p10 = pnand %p613_p11, %p607_p6 }
  0x35   : > { %617 = shalt.err (!%p614_p10)
}
  0x36   : > { %s708_s9 = smov 128   ;;  %s709_s13 = smov 8  }
  0x37   : > { %500 = dma.hbm_to_vmem [thread:$0]  (!%p840_p2), %s186_s28, 2048, %s188_s4, %s174_s5, %s708_s9, %s708_s9, %s709_s13  }
  0x38   : > { %199 = sbr.rel (%p790_p8) target bundleno = 98 (0x62), region = 32  ;;  %s851_s12 = sand.u32 (!%p790_p8), 1, %s686_s15  }
  0x39   : > { %s475_s20 = sshll.u32 (!%p790_p8), %s851_s12, 7  ;;  %s202_s26 = scalar_lea.sflag (!%p790_p8), [#allocation4], %s851_s12 }
  0x3a   : > { %s857_s27 = scalar_lea.vmem (!%p790_p8), [#allocation3], %s475_s20  ;;  %p998_p10 = scmp.ne.s32.totalorder (!%p790_p8), %s991_s23, 0 }
  0x3d   : > { %669 = dma.done.wait (%p998_p10), %s202_s26, 2048  }
  0x3e   : > { %671 = vsyncadd (%p998_p10), %s202_s26, 4294965248 }
  0x3f   : > { %673 = dma.done.wait (%p770_p1), [#allocation7], 128  }
  0x40   : > { %675 = vsyncadd (%p770_p1), [#allocation7], 4294967168  ;;  %v277_v0 = vlaneseq  ;;  %s235_s25 = sld [smem:[#allocation2]]  ;;  %v252_v3 = vld [vmem:[#allocation6] sm:$0x1]  ;;  %v237_v8 = vld [vmem:[%s857_s27 + $0x8] sm:$0xff] }
  0x41   : > { %v253_v6 = vld [vmem:[#allocation6 + $0x1] sm:$0x1]  ;;  %v254_v10 = vld [vmem:[#allocation6 + $0x2] sm:$0x1]  ;;  %v238_v12 = vld [vmem:[%s857_s27 + $0x10] sm:$0xff]  ;;  %vm333_vm0 = vcmask 261120  }
  0x42   : > { %v278_v1 = vshrl.u32 %v277_v0, 7  ;;  %v236_v7 = vld [vmem:[%s857_s27] sm:$0xff]  ;;  %v239_v13 = vld [vmem:[%s857_s27 + $0x18] sm:$0xff]  ;;  %v241_v18 = vld [vmem:[%s857_s27 + $0x28] sm:$0xff]  ;;  %s885_s21 = scalar_lea.vmem [#allocation8], %s475_s20  ;;  %s484_s23 = sshll.u32 %s694_s17, 11 }
  0x43   : > { %v255_v15 = vld [vmem:[#allocation6 + $0x3] sm:$0x1]  ;;  %v256_v20 = vld [vmem:[#allocation6 + $0x4] sm:$0x1]  ;;  %v242_v24 = vld [vmem:[%s857_s27 + $0x30] sm:$0xff]  ;;  %s367_s28 = sshll.u32 %s885_s21, 4  ;;  %s922_s4 = scalar_lea.hbm %s987_s3, %s484_s23  ;;  %s924_s28 = int_to_ptr.vmem [resolvable:$true] %s367_s28 }
  0x44   : > { %v867_v2 = vsub.s32 0, %v278_v1  ;;  %v240_v17 = vld [vmem:[%s857_s27 + $0x20] sm:$0xff]  ;;  %v243_v25 = vld [vmem:[%s857_s27 + $0x38] sm:$0xff]  ;;  %v245_v32 = vld [vmem:[%s857_s27 + $0x48] sm:$0xff]  ;;  %s351_s22 = scalar_lea.sflag [#allocation5], %s851_s12  ;;  %s618_s5 = scalar_lea.vmem %s924_s28, 2048 }
  0x45   : > { %v257_v27 = vld [vmem:[#allocation6 + $0x5] sm:$0x1]  ;;  %v258_v34 = vld [vmem:[#allocation6 + $0x6] sm:$0x1]  ;;  %v246_v38 = vld [vmem:[%s857_s27 + $0x50] sm:$0xff]  ;;  %p619_p1 = scmp.ne.s32.totalorder %s924_s28, %s618_s5  ;;  %s710_s6 = smov [#allocation8]  }
  0x46   : > { %v260_v4 = vstv %s235_s25  ;;  %v244_v31 = vld [vmem:[%s857_s27 + $0x40] sm:$0xff]  ;;  %v247_v39 = vld [vmem:[%s857_s27 + $0x58] sm:$0xff]  ;;  %v249_v46 = vld [vmem:[%s857_s27 + $0x68] sm:$0xff]  ;;  %s622_s7 = sshll.u32 %s710_s6, 4  ;;  %s623_s7 = int_to_ptr.vmem [resolvable:$false] %s622_s7 }
  0x47   : > { %v261_v5 = vmul.f32 %v260_v4, %v252_v3  ;;  %v262_v9 = vmul.f32 %v260_v4, %v253_v6  ;;  %v263_v14 = vmul.f32 %v260_v4, %v254_v10  ;;  %v264_v19 = vmul.f32 %v260_v4, %v255_v15  ;;  %v259_v41 = vld [vmem:[#allocation6 + $0x7] sm:$0x1]  ;;  %v250_v51 = vld [vmem:[%s857_s27 + $0x70] sm:$0xff]  ;;  %v251_v52 = vld [vmem:[%s857_s27 + $0x78] sm:$0xff]  ;;  %p620_p8 = pnand %p619_p1, %p823_p13  ;;  %s624_s8 = scalar_lea.vmem %s623_s7, 4096 }
  0x48   : > { %v265_v26 = vmul.f32 %v260_v4, %v256_v20  ;;  %v266_v33 = vmul.f32 %v260_v4, %v257_v27  ;;  %v267_v40 = vmul.f32 %v260_v4, %v258_v34  ;;  %v248_v45 = vld [vmem:[%s857_s27 + $0x60] sm:$0xff]  ;;  %v268_v47 = vmul.f32 %v260_v4, %v259_v41  ;;  %p625_p0 = scmp.lt.s32.totalorder %s924_s28, %s623_s7  ;;  %p626_p2 = scmp.lt.s32.totalorder %s624_s8, %s618_s5 }
  0x49   : > { %v280_v11 = vrot.slane %v261_v5, %v867_v2  ;;  %v284_v16 = vrot.slane %v262_v9, %v867_v2  ;;  %v288_v23 = vrot.slane %v263_v14, %v867_v2  ;;  %v292_v30 = vrot.slane %v264_v19, %v867_v2  ;;  %p621_p12 = pneg %p620_p8 }
  0x4a   : > { %v296_v37 = vrot.slane %v265_v26, %v867_v2  ;;  %v300_v44 = vrot.slane %v266_v33, %v867_v2  ;;  %v304_v50 = vrot.slane %v267_v40, %v867_v2  ;;  %v308_v55 = vrot.slane %v268_v47, %v867_v2  ;;  %p627_p3 = por %p626_p2, %p625_p0 }
  0x4b   : > { %v317_v21 = vadd.f32 %v280_v11, %v236_v7  ;;  %v318_v22 = vadd.f32 %v280_v11, %v237_v8  ;;  %v319_v28 = vadd.f32 %v284_v16, %v238_v12  ;;  %v320_v29 = vadd.f32 %v284_v16, %v239_v13 }
  0x4c   : > { %v321_v35 = vadd.f32 %v288_v23, %v240_v17  ;;  %v322_v36 = vadd.f32 %v288_v23, %v241_v18  ;;  %v323_v42 = vadd.f32 %v292_v30, %v242_v24  ;;  %v324_v43 = vadd.f32 %v292_v30, %v243_v25  ;;  %p628_p5 = pnand %p627_p3, %p621_p12 }
  0x4d   : > { %334 = vst.msk [vmem:[%s885_s21] sm:$0xff] %vm333_vm0, %v317_v21  ;;  %335 = vst.msk [vmem:[%s885_s21 + $0x8] sm:$0xff] %vm333_vm0, %v318_v22  ;;  %v325_v48 = vadd.f32 %v296_v37, %v244_v31  ;;  %v326_v49 = vadd.f32 %v296_v37, %v245_v32  ;;  %v327_v53 = vadd.f32 %v300_v44, %v246_v38 }
  0x4e   : > { %336 = vst.msk [vmem:[%s885_s21 + $0x10] sm:$0xff] %vm333_vm0, %v319_v28  ;;  %337 = vst.msk [vmem:[%s885_s21 + $0x18] sm:$0xff] %vm333_vm0, %v320_v29  ;;  %v328_v54 = vadd.f32 %v300_v44, %v247_v39  ;;  %v329_v56 = vadd.f32 %v304_v50, %v248_v45  ;;  %v330_v57 = vadd.f32 %v304_v50, %v249_v46 }
  0x4f   : > { %338 = vst.msk [vmem:[%s885_s21 + $0x20] sm:$0xff] %vm333_vm0, %v321_v35  ;;  %339 = vst.msk [vmem:[%s885_s21 + $0x28] sm:$0xff] %vm333_vm0, %v322_v36  ;;  %v331_v58 = vadd.f32 %v308_v55, %v250_v51  ;;  %v332_v59 = vadd.f32 %v308_v55, %v251_v52 }
  0x50   : > { %340 = vst.msk [vmem:[%s885_s21 + $0x30] sm:$0xff] %vm333_vm0, %v323_v42  ;;  %341 = vst.msk [vmem:[%s885_s21 + $0x38] sm:$0xff] %vm333_vm0, %v324_v43 }
  0x51   : > { %342 = vst.msk [vmem:[%s885_s21 + $0x40] sm:$0xff] %vm333_vm0, %v325_v48  ;;  %343 = vst.msk [vmem:[%s885_s21 + $0x48] sm:$0xff] %vm333_vm0, %v326_v49 }
  0x52   : > { %344 = vst.msk [vmem:[%s885_s21 + $0x50] sm:$0xff] %vm333_vm0, %v327_v53  ;;  %345 = vst.msk [vmem:[%s885_s21 + $0x58] sm:$0xff] %vm333_vm0, %v328_v54 }
  0x53   : > { %346 = vst.msk [vmem:[%s885_s21 + $0x60] sm:$0xff] %vm333_vm0, %v329_v56  ;;  %347 = vst.msk [vmem:[%s885_s21 + $0x68] sm:$0xff] %vm333_vm0, %v330_v57 }
  0x54   : > { %348 = vst.msk [vmem:[%s885_s21 + $0x70] sm:$0xff] %vm333_vm0, %v331_v58  ;;  %349 = vst.msk [vmem:[%s885_s21 + $0x78] sm:$0xff] %vm333_vm0, %v332_v59 }
  0x55   : > { %631 = shalt.err (!%p628_p5)
}
  0x56   : > { %s632_s11 = scalar_lea.hbm %s922_s4, 2048  ;;  %s636_s20 = scalar_lea.hbm %s987_s3, 4096 }
  0x57   : > { %p633_p7 = scmp.ne.s32.totalorder %s922_s4, %s632_s11  ;;  %p637_p9 = scmp.lt.s32.totalorder %s922_s4, %s987_s3 }
  0x58   : > { %p638_p11 = scmp.lt.s32.totalorder %s636_s20, %s632_s11 }
  0x59   : > { %p634_p6 = pnand %p633_p7, %p823_p13 }
  0x5a   : > { %p639_p10 = por %p638_p11, %p637_p9 }
  0x5b   : > { %p635_p4 = pneg %p634_p6 }
  0x5d   : > { %p640_p1 = pnand %p639_p10, %p635_p4 }
  0x5f   : > { %643 = shalt.err (!%p640_p1)
}
  0x60   : > { %s711_s25 = smov 128   ;;  %s712_s21 = smov 8  }
  0x61   : > { %491 = dma.vmem_to_hbm [thread:$0]  (%p823_p13), %s924_s28, 2048, %s922_s4, %s351_s22, %s711_s25, %s711_s25, %s712_s21  }
  0x62 PF: > { %s382_s23 = sand.u32 1, %s682_s14   ;;  %p999_p8 = scmp.ne.s32.totalorder %s992_s24, 0 }
  0x63   : > { %p1000_p12 = scmp.ge.s32.totalorder %s702_s19, 2  ;;  %s383_s17 = scalar_lea.sflag [#allocation5], %s382_s23 }
  0x65   : > { %p502_p0 = pnand %p1000_p12, %p999_p8 }
  0x67   : > { %p503_p2 = pneg %p502_p0 }
  0x69   : > { %677 = dma.done.wait (%p503_p2), %s383_s17, 2048  }
  0x6a   : > { %679 = vsyncadd (%p503_p2), %s383_s17, 4294965248  ;;  %s21_s19 = sadd.s32 1, %s702_s19   ;;  %s1001_s14 = smov %s686_s15 }
  0x6b   : > { %p18_p3 = scmp.ge.s32.totalorder %s21_s19, 4   ;;  %s1002_s15 = smov %s690_s16 }
  0x6c   : > { %s1003_s16 = smov %s832_s0  ;;  %s1004_s17 = smov %s698_s18 }
  0x6d   : > { %s1005_s18 = smov %s1007_s29  ;;  %20 = sbr.rel (!%p18_p3) target bundleno = 9 (0x9), region = 82 }
  0x72   :  { %388 = vsyncpa [#allocation4], 1 }
  0x73   :  { %390 = vsyncpa [#allocation4 + $0x1], 1 }
  0x74   :  { %391 = vsyncpa [#allocation7], 1 }
  0x75   :  { %392 = vsyncpa [#allocation5], 1 }
  0x76   :  { %394 = vsyncpa [#allocation5 + $0x1], 1 }

</bundles_post_ra>
